<compile_context>
chip_gen: v7x
topology: tpu7x:2x2x1
jax: 0.10.0
libtpu: 0.0.40
codegen_flags: <defaults>
</compile_context>

<pallas_src>
import jax
import jax.numpy as jnp
from jax.experimental import pallas as pl
from jax.experimental.pallas import tpu as pltpu


# ------------------------------ helpers --------------------------------------
def _round_up(v: int, m: int) -> int:
    return -(-v // m) * m


def _pick_compute_dtype(x_dtype):
    """f32 inputs -> f32 math; bf16 inputs -> bf16 math on v6e/v7x, f32 on older chips."""
    x_dtype = jnp.dtype(x_dtype)
    if x_dtype == jnp.dtype(jnp.float32):
        return jnp.dtype(jnp.float32)
    try:
        kind = jax.devices()[0].device_kind.lower()
    except Exception:
        kind = ""
    has_bf16_vpu = ("v6" in kind) or ("v7" in kind) or ("trillium" in kind)
    if x_dtype == jnp.dtype(jnp.bfloat16) and has_bf16_vpu:
        return jnp.dtype(jnp.bfloat16)   # skip the full-tile f32 upcast
    return jnp.dtype(jnp.float32)        # v5e & older: no bf16 VALU


def _choose_bt(T, Hq, Hk, D, x_itemsize, cache_w, cache_itemsize,
               budget_bytes=16 * 1024 * 1024, bt_cap=256):
    """Pick a time tile from a conservative VMEM budget (fits v5e's 16 MiB default
    scoped VMEM and v7x's 64 MiB physical with headroom)."""
    if T <= 8:
        return T
    dpad = _round_up(D, 128)
    # double-buffered (in + out) q/k tiles; second-to-minor dim pads to >= 8 sublanes
    row_bytes = 2 * 2 * (_round_up(Hq, 8) + _round_up(Hk, 8)) * dpad * x_itemsize
    # four double-buffered cos/sin cache tiles
    row_bytes += 2 * 4 * _round_up(cache_w, 128) * cache_itemsize
    bt = budget_bytes // max(row_bytes, 1)
    bt = max(8, min(bt_cap, (bt // 8) * 8))
    return min(bt, _round_up(T, 8))


# ------------------------------ Pallas kernel ---------------------------------
def _make_rope_kernel(*, R: int, D: int, fast: bool, compute_dtype):
    cdt = compute_dtype

    def rotate(x_ref, c_ref, s_ref, o_ref):
        # caches arrive pre-cast to the compute dtype; broadcast over heads
        c = c_ref[...][:, None, :]                    # (BT, 1, D | R)
        s = s_ref[...][:, None, :]
        if fast:
            # D == 2R, lane aligned: full-width rotation, single unmasked store.
            x = x_ref[0].astype(cdt)                  # (BT, H, D)
            xr = pltpu.roll(x, shift=R, axis=2)       # [x1, x0] per head (D == 2R)
            o_ref[0] = (x * c + xr * s).astype(o_ref.dtype)
        else:
            # General / partial-rotary path: write halves directly (no concat,
            # no full `out` temporary); tail passes through in the input dtype.
            x = x_ref[0]                              # (BT, H, D), input dtype
            x0 = x[..., :R].astype(cdt)
            x1 = x[..., R:2 * R].astype(cdt)
            o_ref[0, :, :, :R] = (x0 * c - x1 * s).astype(o_ref.dtype)
            o_ref[0, :, :, R:2 * R] = (x0 * s + x1 * c).astype(o_ref.dtype)
            if D > 2 * R:
                o_ref[0, :, :, 2 * R:] = x[..., 2 * R:]

    def kernel(q_ref, k_ref, cq_ref, sq_ref, ck_ref, sk_ref, qo_ref, ko_ref):
        rotate(q_ref, cq_ref, sq_ref, qo_ref)
        rotate(k_ref, ck_ref, sk_ref, ko_ref)

    return kernel


def _build_full_caches(cos, sin, offset, T, fast, conjugate, cdt):
    """Slice the (TR, R) caches at the offset and (fast path) expand to full width."""
    c = jax.lax.dynamic_slice_in_dim(cos, offset, T, axis=0).astype(jnp.float32)
    s = jax.lax.dynamic_slice_in_dim(sin, offset, T, axis=0).astype(jnp.float32)
    if conjugate:                                     # backward pass: sin -> -sin
        s = -s
    if fast:
        c = jnp.concatenate([c, c], axis=-1)          # (T, D): [cos,  cos]
        s = jnp.concatenate([-s, s], axis=-1)         # (T, D): [-sin, sin]
    return c.astype(cdt), s.astype(cdt)


# ------------------------------ wrapper ---------------------------------------
def rotary_embedding_pallas(q, k, cos, sin, cos_k=None, sin_k=None, *,
                            seqlen_offset: int = 0, interleaved: bool = False,
                            conjugate: bool = False, compute_dtype=None):
    """Apply RoPE to q [B,T,Hq,D] and k [B,T,Hk,D] (caches [TR, R]) in one fused
    Pallas call.  Returns (q_out, k_out)."""
    if interleaved:
        # TODO(synk): GPT-J interleaved layout needs an even/odd lane swizzle.
        raise NotImplementedError("interleaved (GPT-J) layout not implemented")
    if not isinstance(seqlen_offset, int):
        # TODO(synk): tensor seqlen_offsets / varlen (cu_seqlens) need scalar prefetch.
        raise NotImplementedError("tensor seqlen_offsets not implemented")
    if cos_k is None:
        cos_k = cos
    if sin_k is None:
        sin_k = sin

    B, T, Hq, D = q.shape
    Bk, Tk, Hk, Dk = k.shape
    assert (Bk, Tk, Dk) == (B, T, D), "q/k must share batch, time and head dim"
    TR, R = cos.shape
    assert sin.shape == (TR, R) and cos_k.shape == (TR, R) and sin_k.shape == (TR, R)
    assert D <= 256, "Only support D <= 256"
    assert 2 * R <= D
    assert seqlen_offset + T <= TR

    cdt = jnp.dtype(compute_dtype) if compute_dtype is not None \
        else _pick_compute_dtype(q.dtype)

    # Fast full-width roll path when the rotation spans the whole lane-aligned
    # head dim; otherwise split-halves fallback with direct sub-stores.
    fast = (2 * R == D) and (D % 128 == 0)

    cq, sq = _build_full_caches(cos, sin, seqlen_offset, T, fast, conjugate, cdt)
    ck, sk = _build_full_caches(cos_k, sin_k, seqlen_offset, T, fast, conjugate, cdt)
    cache_w = cq.shape[-1]

    BT = _choose_bt(T, Hq, Hk, D, q.dtype.itemsize, cache_w, cdt.itemsize)
    NT = pl.cdiv(T, BT)

    kernel = _make_rope_kernel(R=R, D=D, fast=fast, compute_dtype=cdt)

    # NOTE: blocks keep the native [B, T, H, D] layout — for H < 8 the (H, D)
    # slab is sublane-padded in VMEM but no extra HBM passes are introduced.
    # TODO(synk): for tiny H (MQA k) a lane-merged (B, T, H*D) layout would be
    # denser but needs head-tiled caches or a grouped roll.
    def x_spec(H):
        return pl.BlockSpec((1, BT, H, D), lambda b, t: (b, t, 0, 0))

    c_spec = pl.BlockSpec((BT, cache_w), lambda b, t: (t, 0))

    n_q = B * T * Hq * D
    n_k = B * T * Hk * D
    bytes_accessed = (2 * (n_q * q.dtype.itemsize + n_k * k.dtype.itemsize)
                      + 4 * B * T * cache_w * cdt.itemsize)

    q_out, k_out = pl.pallas_call(
        kernel,
        out_shape=(jax.ShapeDtypeStruct(q.shape, q.dtype),
                   jax.ShapeDtypeStruct(k.shape, k.dtype)),
        grid_spec=pltpu.PrefetchScalarGridSpec(
            num_scalar_prefetch=0,
            grid=(B, NT),
            in_specs=[x_spec(Hq), x_spec(Hk), c_spec, c_spec, c_spec, c_spec],
            out_specs=[x_spec(Hq), x_spec(Hk)],
        ),
        compiler_params=pltpu.CompilerParams(
            # TODO(synk): when B * NT < 2 (single-token decode) add H as an
            # extra parallel grid axis so both v7x TensorCores get work.
            dimension_semantics=("parallel", "parallel"),
            vmem_limit_bytes=32 * 1024 * 1024),
        cost_estimate=pl.CostEstimate(flops=3 * (n_q + n_k), transcendentals=0,
                                      bytes_accessed=int(bytes_accessed)),
    )(q, k, cq, sq, ck, sk)
    return q_out, k_out


# --------------------------- Module-level wrapper ------------------------------
class RotaryEmbedding:
    """JAX/Pallas port of fla.modules.rotary.RotaryEmbedding (forward only)."""

    def __init__(self, dim: int, base: float = 10000.0, scale_base=None,
                 interleaved: bool = False, pos_idx_in_fp32: bool = True):
        self.dim = dim
        self.base = float(base)
        self.scale_base = scale_base
        self.interleaved = interleaved
        self.pos_idx_in_fp32 = pos_idx_in_fp32
        self.inv_freq = 1.0 / (self.base ** (
            jnp.arange(0, dim, 2, dtype=jnp.float32) / dim))
        if scale_base is not None:
            self.scale = (jnp.arange(0, dim, 2, dtype=jnp.float32)
                          + 0.4 * dim) / (1.4 * dim)
        else:
            self.scale = None

    def _build_cache(self, seqlen: int):
        # Caches are kept in float32 (tiny arrays): avoids the reference's
        # down-cast/up-cast round trip and preserves rotation precision.
        if self.pos_idx_in_fp32:
            t = jnp.arange(seqlen, dtype=jnp.float32)
        else:
            t = jnp.arange(seqlen, dtype=self.inv_freq.dtype)
        freqs = jnp.outer(t, self.inv_freq)                        # [TR, R]
        if self.scale is None:
            cos = jnp.cos(freqs)
            sin = jnp.sin(freqs)
            return cos, sin, cos, sin
        power = (jnp.arange(seqlen, dtype=jnp.float32)
                 - seqlen // 2) / self.scale_base
        scale = self.scale[None, :] ** power[:, None]
        return (jnp.cos(freqs) * scale, jnp.sin(freqs) * scale,
                jnp.cos(freqs) / scale, jnp.sin(freqs) / scale)

    def __call__(self, q, k, seqlen_offset: int = 0, max_seqlen=None):
        seqlen = max_seqlen if max_seqlen is not None else q.shape[1] + seqlen_offset
        cos, sin, cos_k, sin_k = self._build_cache(seqlen)
        return rotary_embedding_pallas(q, k, cos, sin, cos_k, sin_k,
                                       seqlen_offset=seqlen_offset,
                                       interleaved=self.interleaved)


# ---------------------------------- test ---------------------------------------
def _rope_reference(x, cos, sin, offset, conjugate=False):
    B, T, H, D = x.shape
    R = cos.shape[-1]
    c = cos[offset:offset + T][None, :, None, :].astype(jnp.float32)
    s = sin[offset:offset + T][None, :, None, :].astype(jnp.float32)
    if conjugate:
        s = -s
    xf = x.astype(jnp.float32)
    x0, x1 = xf[..., :R], xf[..., R:2 * R]
    out = jnp.concatenate([x0 * c - x1 * s, x0 * s + x1 * c, xf[..., 2 * R:]],
                          axis=-1)
    return out.astype(x.dtype)


if __name__ == "__main__":
    key = jax.random.PRNGKey(0)
    kq, kk, kq2, kk2 = jax.random.split(key, 4)

    # -- fast path: full rotary, lane-aligned head dim, GQA-style head counts --
    B, T, Hq, Hk, D = 2, 8, 4, 2, 128
    q = jax.random.normal(kq, (B, T, Hq, D), dtype=jnp.float32)
    k = jax.random.normal(kk, (B, T, Hk, D), dtype=jnp.float32)

    rope = RotaryEmbedding(dim=D)
    q_out, k_out = rope(q, k, seqlen_offset=0)
    q_out = jax.block_until_ready(q_out)
    k_out = jax.block_until_ready(k_out)

    cos, sin, _, _ = rope._build_cache(T)
    assert jnp.allclose(q_out, _rope_reference(q, cos, sin, 0), atol=1e-5, rtol=1e-5)
    assert jnp.allclose(k_out, _rope_reference(k, cos, sin, 0), atol=1e-5, rtol=1e-5)

    # -- fallback path: partial rotary dim (2R < D) + conjugate (backward sign) --
    B2, T2, H2, D2, rot_dim = 1, 16, 2, 64, 32
    q2 = jax.random.normal(kq2, (B2, T2, H2, D2), dtype=jnp.float32)
    k2 = jax.random.normal(kk2, (B2, T2, H2, D2), dtype=jnp.float32)
    rope2 = RotaryEmbedding(dim=rot_dim)
    cos2, sin2, _, _ = rope2._build_cache(T2)
    q2_out, k2_out = rotary_embedding_pallas(q2, k2, cos2, sin2,
                                             seqlen_offset=0, conjugate=True)
    q2_out = jax.block_until_ready(q2_out)
    k2_out = jax.block_until_ready(k2_out)
    assert jnp.allclose(q2_out, _rope_reference(q2, cos2, sin2, 0, conjugate=True),
                        atol=1e-5, rtol=1e-5)
    assert jnp.allclose(k2_out, _rope_reference(k2, cos2, sin2, 0, conjugate=True),
                        atol=1e-5, rtol=1e-5)

    print("KERNEL_OK")
</pallas_src>

<mosaic_0001>
module attributes {stable_mosaic.version = 11 : i64} {
  func.func @kernel(%arg0: i32, %arg1: i32, %arg2: memref<1x8x4x128xf32, #tpu.memory_space<vmem>>, %arg3: memref<1x8x2x128xf32, #tpu.memory_space<vmem>>, %arg4: memref<8x128xf32, #tpu.memory_space<vmem>>, %arg5: memref<8x128xf32, #tpu.memory_space<vmem>>, %arg6: memref<8x128xf32, #tpu.memory_space<vmem>>, %arg7: memref<8x128xf32, #tpu.memory_space<vmem>>, %arg8: memref<1x8x4x128xf32, #tpu.memory_space<vmem>>, %arg9: memref<1x8x2x128xf32, #tpu.memory_space<vmem>>) attributes {dimension_semantics = [#tpu.dimension_semantics<parallel>, #tpu.dimension_semantics<parallel>], iteration_bounds = array<i64: 2, 1>, scalar_prefetch = 0 : i64, scratch_operands = 0 : i64, tpu.core_type = #tpu.core_type<tc>, window_params = [{transform_indices = @transform_0, window_bounds = array<i64: 1, 8, 4, 128>}, {transform_indices = @transform_1, window_bounds = array<i64: 1, 8, 2, 128>}, {transform_indices = @transform_2, window_bounds = array<i64: 8, 128>}, {transform_indices = @transform_3, window_bounds = array<i64: 8, 128>}, {transform_indices = @transform_4, window_bounds = array<i64: 8, 128>}, {transform_indices = @transform_5, window_bounds = array<i64: 8, 128>}, {transform_indices = @transform_6, window_bounds = array<i64: 1, 8, 4, 128>}, {transform_indices = @transform_7, window_bounds = array<i64: 1, 8, 2, 128>}]} {
    %c0 = arith.constant 0 : index
    %c0_0 = arith.constant 0 : index
    %0 = vector.load %arg4[%c0, %c0_0] : memref<8x128xf32, #tpu.memory_space<vmem>>, vector<8x128xf32>
    %1 = vector.shape_cast %0 : vector<8x128xf32> to vector<8x1x128xf32>
    %c0_1 = arith.constant 0 : index
    %c0_2 = arith.constant 0 : index
    %2 = vector.load %arg5[%c0_1, %c0_2] : memref<8x128xf32, #tpu.memory_space<vmem>>, vector<8x128xf32>
    %3 = vector.shape_cast %2 : vector<8x128xf32> to vector<8x1x128xf32>
    %c0_3 = arith.constant 0 : index
    %c0_4 = arith.constant 0 : index
    %c0_5 = arith.constant 0 : index
    %c0_6 = arith.constant 0 : index
    %4 = vector.load %arg2[%c0_3, %c0_4, %c0_5, %c0_6] : memref<1x8x4x128xf32, #tpu.memory_space<vmem>>, vector<1x8x4x128xf32>
    %5 = vector.shape_cast %4 : vector<1x8x4x128xf32> to vector<8x4x128xf32>
    %c64_i32 = arith.constant 64 : i32
    %6 = tpu.dynamic_rotate %5 by %c64_i32 dim 2 : vector<8x4x128xf32>, i32 -> vector<8x4x128xf32>
    %7 = vector.broadcast %1 : vector<8x1x128xf32> to vector<8x4x128xf32>
    %8 = arith.mulf %5, %7 : vector<8x4x128xf32>
    %9 = vector.broadcast %3 : vector<8x1x128xf32> to vector<8x4x128xf32>
    %10 = arith.mulf %6, %9 : vector<8x4x128xf32>
    %11 = arith.addf %8, %10 : vector<8x4x128xf32>
    %c0_7 = arith.constant 0 : index
    %c0_8 = arith.constant 0 : index
    %c0_9 = arith.constant 0 : index
    %c0_10 = arith.constant 0 : index
    %12 = vector.load %arg8[%c0_7, %c0_8, %c0_9, %c0_10] : memref<1x8x4x128xf32, #tpu.memory_space<vmem>>, vector<1x8x4x128xf32>
    %13 = vector.shape_cast %12 : vector<1x8x4x128xf32> to vector<8x4x128xf32>
    %14 = vector.shape_cast %11 : vector<8x4x128xf32> to vector<1x8x4x128xf32>
    tpu.vector_store %arg8[%c0_7, %c0_8, %c0_9, %c0_10], %14 {strides = array<i32>} : memref<1x8x4x128xf32, #tpu.memory_space<vmem>>, vector<1x8x4x128xf32>,
    %c0_11 = arith.constant 0 : index
    %c0_12 = arith.constant 0 : index
    %15 = vector.load %arg6[%c0_11, %c0_12] : memref<8x128xf32, #tpu.memory_space<vmem>>, vector<8x128xf32>
    %16 = vector.shape_cast %15 : vector<8x128xf32> to vector<8x1x128xf32>
    %c0_13 = arith.constant 0 : index
    %c0_14 = arith.constant 0 : index
    %17 = vector.load %arg7[%c0_13, %c0_14] : memref<8x128xf32, #tpu.memory_space<vmem>>, vector<8x128xf32>
    %18 = vector.shape_cast %17 : vector<8x128xf32> to vector<8x1x128xf32>
    %c0_15 = arith.constant 0 : index
    %c0_16 = arith.constant 0 : index
    %c0_17 = arith.constant 0 : index
    %c0_18 = arith.constant 0 : index
    %19 = vector.load %arg3[%c0_15, %c0_16, %c0_17, %c0_18] : memref<1x8x2x128xf32, #tpu.memory_space<vmem>>, vector<1x8x2x128xf32>
    %20 = vector.shape_cast %19 : vector<1x8x2x128xf32> to vector<8x2x128xf32>
    %c64_i32_19 = arith.constant 64 : i32
    %21 = tpu.dynamic_rotate %20 by %c64_i32_19 dim 2 : vector<8x2x128xf32>, i32 -> vector<8x2x128xf32>
    %22 = vector.broadcast %16 : vector<8x1x128xf32> to vector<8x2x128xf32>
    %23 = arith.mulf %20, %22 : vector<8x2x128xf32>
    %24 = vector.broadcast %18 : vector<8x1x128xf32> to vector<8x2x128xf32>
    %25 = arith.mulf %21, %24 : vector<8x2x128xf32>
    %26 = arith.addf %23, %25 : vector<8x2x128xf32>
    %c0_20 = arith.constant 0 : index
    %c0_21 = arith.constant 0 : index
    %c0_22 = arith.constant 0 : index
    %c0_23 = arith.constant 0 : index
    %27 = vector.load %arg9[%c0_20, %c0_21, %c0_22, %c0_23] : memref<1x8x2x128xf32, #tpu.memory_space<vmem>>, vector<1x8x2x128xf32>
    %28 = vector.shape_cast %27 : vector<1x8x2x128xf32> to vector<8x2x128xf32>
    %29 = vector.shape_cast %26 : vector<8x2x128xf32> to vector<1x8x2x128xf32>
    tpu.vector_store %arg9[%c0_20, %c0_21, %c0_22, %c0_23], %29 {strides = array<i32>} : memref<1x8x2x128xf32, #tpu.memory_space<vmem>>, vector<1x8x2x128xf32>,
    return
  }
  func.func @transform_0(%arg0: i32, %arg1: i32) -> (i32, i32, i32, i32) {
    %c0_i32 = arith.constant 0 : i32
    %c0_i32_0 = arith.constant 0 : i32
    %c0_i32_1 = arith.constant 0 : i32
    return %arg0, %arg1, %c0_i32, %c0_i32_0 : i32, i32, i32, i32
  }
  func.func @transform_1(%arg0: i32, %arg1: i32) -> (i32, i32, i32, i32) {
    %c0_i32 = arith.constant 0 : i32
    %c0_i32_0 = arith.constant 0 : i32
    %c0_i32_1 = arith.constant 0 : i32
    return %arg0, %arg1, %c0_i32, %c0_i32_0 : i32, i32, i32, i32
  }
  func.func @transform_2(%arg0: i32, %arg1: i32) -> (i32, i32) {
    %c0_i32 = arith.constant 0 : i32
    %c0_i32_0 = arith.constant 0 : i32
    return %arg1, %c0_i32 : i32, i32
  }
  func.func @transform_3(%arg0: i32, %arg1: i32) -> (i32, i32) {
    %c0_i32 = arith.constant 0 : i32
    %c0_i32_0 = arith.constant 0 : i32
    return %arg1, %c0_i32 : i32, i32
  }
  func.func @transform_4(%arg0: i32, %arg1: i32) -> (i32, i32) {
    %c0_i32 = arith.constant 0 : i32
    %c0_i32_0 = arith.constant 0 : i32
    return %arg1, %c0_i32 : i32, i32
  }
  func.func @transform_5(%arg0: i32, %arg1: i32) -> (i32, i32) {
    %c0_i32 = arith.constant 0 : i32
    %c0_i32_0 = arith.constant 0 : i32
    return %arg1, %c0_i32 : i32, i32
  }
  func.func @transform_6(%arg0: i32, %arg1: i32) -> (i32, i32, i32, i32) {
    %c0_i32 = arith.constant 0 : i32
    %c0_i32_0 = arith.constant 0 : i32
    %c0_i32_1 = arith.constant 0 : i32
    return %arg0, %arg1, %c0_i32, %c0_i32_0 : i32, i32, i32, i32
  }
  func.func @transform_7(%arg0: i32, %arg1: i32) -> (i32, i32, i32, i32) {
    %c0_i32 = arith.constant 0 : i32
    %c0_i32_0 = arith.constant 0 : i32
    %c0_i32_1 = arith.constant 0 : i32
    return %arg0, %arg1, %c0_i32, %c0_i32_0 : i32, i32, i32, i32
  }
}

</mosaic_0001>

<bundles_post_ra>
// kernel: tpu_custom_call.1
= control target key start
LH: loop header
LB: loop body
LE: loop exit
PB: predicated region body
PF: predicated region fallthrough
CT: control target
= control target key end

     0   :  { %s2140_s0 = inlined_call_operand.hbm [shape: f32[2,8,4,128], index: 0, kind: input, shape index: {}]   ;;  %s2141_s1 = inlined_call_operand.hbm [shape: f32[2,8,2,128], index: 1, kind: input, shape index: {}]   ;;  %s2142_s2 = inlined_call_operand.hbm [shape: f32[8,128], index: 2, kind: input, shape index: {}]   ;;  %s2143_s3 = inlined_call_operand.vmem [shape: f32[8,128], index: 3, kind: input, shape index: {}]   ;;  %s2144_s4 = inlined_call_operand.hbm [shape: f32[8,128], index: 4, kind: input, shape index: {}]   ;;  %s2145_s5 = inlined_call_operand.vmem [shape: f32[8,128], index: 5, kind: input, shape index: {}]   ;;  %s2146_s6 = inlined_call_operand.hbm [shape: f32[2,8,4,128], index: 6, kind: output, shape index: {0}]   ;;  %s2147_s7 = inlined_call_operand.hbm [shape: f32[2,8,2,128], index: 7, kind: output, shape index: {1}]  }
   0x1   :  { %2156 = sst [smem:[#allocation23_spill]] %s2140_s0 }
   0x2   :  { %2157 = sst [smem:[#allocation24_spill]] %s2142_s2 }
   0x3   :  { %2158 = sst [smem:[#allocation25_spill]] %s2144_s4 }
   0x4   :  { %13 = vsyncpa [#allocation3], 0 }
   0x5   :  { %15 = vsyncpa [#allocation3 + $0x1], 0 }
   0x6   :  { %16 = vsyncpa [#allocation6], 0 }
   0x7   :  { %18 = vsyncpa [#allocation6 + $0x1], 0 }
   0x8   :  { %19 = vsyncpa [#allocation9], 0 }
   0x9   :  { %20 = vsyncpa [#allocation4], 0 }
   0xa   :  { %22 = vsyncpa [#allocation4 + $0x1], 0 }
   0xb   :  { %23 = vsyncpa [#allocation12], 0 }
   0xc   :  { %25 = vsyncpa [#allocation12 + $0x1], 0  ;;  %s1603_s24 = smov 0   ;;  %s1605_s25 = smov 0  }
   0xd   :  { %s1607_s26 = smov 0   ;;  %s1609_s27 = smov 0  }
   0xe   :  { %s1611_s28 = smov 0   ;;  %s1613_s29 = smov 0  }
   0xf LB: > { %2159 = sst [smem:[#allocation19_spill]] %s1534_s26  ;;  %s1634_s30 = sadd.s32 4294967295, %s1546_s29   ;;  %s1546_s29 = sphi %s1613_s29, %s31_s29   ;;  %s1542_s28 = sphi %s1611_s28, %s2191_s28   ;;  %s1538_s27 = sphi %s1609_s27, %s2190_s27   ;;  %s1534_s26 = sphi %s1607_s26, %s2186_s26   ;;  %s1530_s25 = sphi %s1605_s25, %s2189_s25   ;;  %s1526_s24 = sphi %s1603_s24, %s2188_s24  }
  0x10   : > { %s1166_s8 = sadd.s32 4294967294, %s1546_s29   ;;  %p59_p0 = scmp.ne.s32.totalorder %s1534_s26, %s1530_s25 }
  0x11   : > { %p60_p1 = scmp.eq.s32.totalorder %s1546_s29, 0  ;;  %p65_p2 = scmp.ne.s32.totalorder %s1530_s25, %s1526_s24 }
  0x12   : > { %p2148_p3 = scmp.eq.s32.totalorder %s1634_s30, 0  ;;  %p223_p4 = scmp.eq.s32.totalorder %s1634_s30, 1 }
  0x13   : > { %p1645_p5 = por %p60_p1, %p59_p0  ;;  %p229_p6 = scmp.eq.s32.totalorder %s1166_s8, 1 }
  0x14   : > { %p1651_p7 = por %p2148_p3, %p65_p2  ;;  %p1655_p8 = por %p223_p4, %p59_p0 }
  0x15   : > { %p1659_p9 = por %p229_p6, %p65_p2  ;;  %p1167_p10 = scmp.ge.s32.totalorder %s1546_s29, 1 }
  0x16   : > { %s2161_s11 = scalar_select %p1651_p7, 1, 0 }
  0x17   : > { %s2162_s12 = scalar_select %p1655_p8, 1, 0 }
  0x18   : > { %s2163_s13 = scalar_select %p1659_p9, 1, 0 }
  0x19   : > { %p264_p11 = scmp.lt.s32.totalorder %s1546_s29, 3  ;;  %s1548_s15 = smov [#allocation7]  }
  0x1a   : > { %2164 = sst [smem:[#allocation20_spill]] %s2163_s13  ;;  %s279_s16 = sshll.u32 %s1548_s15, 4  ;;  %s280_s16 = int_to_ptr.vmem [resolvable:$true] %s279_s16 }
  0x1b   : > { %p1666_p13 = pnand %p1167_p10, %p264_p11  ;;  %p1237_p1 = scmp.lt.s32.totalorder %s1546_s29, 2 }
  0x1c   : > { %s1549_s18 = smov [#allocation8]   ;;  %s2168_s2 = sld [smem:[#allocation24_spill]] }
  0x1d   : > { %s2165_s14 = scalar_select %p1666_p13, 1, 0 }
  0x1e   : > { %p1214_p0 = pneg %p1666_p13  ;;  %p1675_p4 = pnand %p1237_p1, %p1645_p5 }
  0x1f   : > { %s299_s19 = sshll.u32 %s1549_s18, 4  ;;  %s1685_s19 = int_to_ptr.vmem [resolvable:$true] %s299_s19 }
  0x20   : > { %s2166_s17 = scalar_select %p1675_p4, 1, 0 }
  0x21   : > { %p1681_p2 = pnand %p1214_p0, %p2148_p3 }
  0x22   : > { %s1304_s23 = scalar_lea.hbm %s2168_s2, 128 }
  0x23   : > { %p1305_p5 = scmp.ne.s32.totalorder %s2168_s2, %s1304_s23  ;;  %p1306_p6 = pneg %p1681_p2 }
  0x24   : > { %p1311_p1 = scmp.lt.u32.totalorder %s1304_s23, %s2168_s2 }
  0x25   : > { %p1307_p10 = pnand %p1306_p6, %p1305_p5 }
  0x27   : > { %p1308_p11 = pneg %p1307_p10 }
  0x29   : > { %p1313_p0 = pnand %p1311_p1, %p1308_p11 }
  0x2b   : > { %1316 = shalt.err (!%p1313_p0)
}
  0x2c   : > { %s1317_s9 = scalar_lea.vmem %s280_s16, 128  ;;  %p1325_p8 = scmp.lt.s32.totalorder %s280_s16, %s280_s16 }
  0x2d   : > { %p1318_p12 = scmp.ne.s32.totalorder %s280_s16, %s1317_s9  ;;  %p1326_p7 = scmp.lt.s32.totalorder %s1317_s9, %s1317_s9 }
  0x2f   : > { %p1320_p3 = pnand %p1318_p12, %p1306_p6  ;;  %p1327_p13 = por %p1326_p7, %p1325_p8 }
  0x31   : > { %p1321_p9 = pneg %p1320_p3 }
  0x33   : > { %p1328_p4 = pnand %p1327_p13, %p1321_p9 }
  0x35   : > { %1331 = shalt.err (!%p1328_p4)
}
  0x36   : > { %1217 = dma.hbm_to_vmem [thread:$0]  (!%p1681_p2), %s2168_s2, 128, %s280_s16, [#allocation6]  }
  0x37   : > { %s2169_s4 = sld [smem:[#allocation25_spill]] }
  0x3d   : > { %s1332_s10 = scalar_lea.hbm %s2169_s4, 128 }
  0x3e   : > { %p1333_p3 = scmp.ne.s32.totalorder %s2169_s4, %s1332_s10  ;;  %p1339_p9 = scmp.lt.u32.totalorder %s1332_s10, %s2169_s4 }
  0x40   : > { %p1335_p7 = pnand %p1333_p3, %p1306_p6 }
  0x42   : > { %p1336_p8 = pneg %p1335_p7 }
  0x44   : > { %p1341_p12 = pnand %p1339_p9, %p1336_p8 }
  0x46   : > { %1344 = shalt.err (!%p1341_p12)
}
  0x47   : > { %s1345_s16 = scalar_lea.vmem %s1685_s19, 128  ;;  %p1353_p10 = scmp.lt.s32.totalorder %s1685_s19, %s1685_s19 }
  0x48   : > { %p1346_p13 = scmp.ne.s32.totalorder %s1685_s19, %s1345_s16  ;;  %p1354_p11 = scmp.lt.s32.totalorder %s1345_s16, %s1345_s16 }
  0x4a   : > { %p1348_p4 = pnand %p1346_p13, %p1306_p6  ;;  %p1355_p1 = por %p1354_p11, %p1353_p10 }
  0x4c   : > { %p1349_p5 = pneg %p1348_p4 }
  0x4e   : > { %p1356_p0 = pnand %p1355_p1, %p1349_p5 }
  0x50   : > { %1359 = shalt.err (!%p1356_p0)
}
  0x51   : > { %1220 = dma.hbm_to_vmem [thread:$0]  (!%p1681_p2), %s2169_s4, 128, %s1685_s19, [#allocation9]  }
  0x52   : > { %s43_s22 = sadd.s32 1, %s1542_s28  ;;  %s1736_s23 = sand.u32 1, %s1534_s26  }
  0x53   : > { %p45_p6 = scmp.ge.s32.totalorder %s43_s22, 2  ;;  %s1173_s20 = sshll.u32 %s1736_s23, 5 }
  0x54   : > { %s1194_s8 = sshll.u32 %s1542_s28, 9  ;;  %s2171_s0 = sld [smem:[#allocation23_spill]] }
  0x55   : > { %s2193_s22 = smov (%p45_p6, %s43_s22), 0  ;;  %s321_s9 = scalar_lea.vmem [#allocation2], %s1173_s20 }
  0x56   : > { %2170 = sst [smem:[#allocation21_spill]] %s2193_s22  ;;  %s47_s19 = ssub.s32 %s1542_s28, %s2193_s22 }
  0x57   : > { %s330_s16 = sshll.u32 %s321_s9, 4  ;;  %p50_p2 = scmp.eq.s32.totalorder %s47_s19, 0  ;;  %s1749_s16 = int_to_ptr.vmem [resolvable:$true] %s330_s16 }
  0x58   : > { %s2172_s13 = sadd.s32 1, %s1534_s26  ;;  %s318_s2 = scalar_lea.sflag [#allocation3], %s1736_s23 }
  0x59   : > { %s1754_s21 = scalar_select %p50_p2, %s1534_s26, %s2172_s13  }
  0x5a   : > { %s1745_s18 = scalar_lea.hbm %s2171_s0, %s1194_s8  ;;  %p2174_p7 = scmp.ne.s32.totalorder %s2166_s17, 0 }
  0x5b   : > { %2173 = sst [smem:[#allocation22_spill]] %s1754_s21  ;;  %s1360_s4 = scalar_lea.hbm %s1745_s18, 512 }
  0x5c   : > { %p1361_p3 = scmp.ne.s32.totalorder %s1745_s18, %s1360_s4  ;;  %p1362_p8 = pneg %p2174_p7 }
  0x5d   : > { %s1365_s20 = scalar_lea.hbm %s2171_s0, 1024  ;;  %p1366_p13 = scmp.lt.u32.totalorder %s1745_s18, %s2171_s0 }
  0x5e   : > { %p1363_p9 = pnand %p1362_p8, %p1361_p3  ;;  %p1367_p4 = scmp.lt.u32.totalorder %s1365_s20, %s1360_s4 }
  0x5f   : > { %p1369_p10 = scmp.lt.u32.totalorder %s1360_s4, %s1745_s18 }
  0x60   : > { %p1364_p12 = pneg %p1363_p9  ;;  %p1368_p5 = por %p1367_p4, %p1366_p13 }
  0x62   : > { %p1370_p11 = por %p1369_p10, %p1368_p5 }
  0x64   : > { %p1371_p1 = pnand %p1370_p11, %p1364_p12 }
  0x66   : > { %1374 = shalt.err (!%p1371_p1)
}
  0x67   : > { %s1375_s9 = scalar_lea.vmem %s1749_s16, 512  ;;  %s1550_s13 = smov [#allocation2]  }
  0x68   : > { %p1376_p0 = scmp.ne.s32.totalorder %s1749_s16, %s1375_s9  ;;  %s1380_s8 = sshll.u32 %s1550_s13, 4  ;;  %s1381_s8 = int_to_ptr.vmem [resolvable:$false] %s1380_s8 }
  0x69   : > { %s1382_s10 = scalar_lea.vmem %s1381_s8, 1024  ;;  %p1383_p3 = scmp.lt.s32.totalorder %s1749_s16, %s1381_s8 }
  0x6a   : > { %p1378_p6 = pnand %p1376_p0, %p1362_p8  ;;  %p1384_p9 = scmp.lt.s32.totalorder %s1382_s10, %s1375_s9 }
  0x6c   : > { %p1379_p2 = pneg %p1378_p6  ;;  %p1385_p13 = por %p1384_p9, %p1383_p3 }
  0x6e   : > { %p1386_p4 = pnand %p1385_p13, %p1379_p2 }
  0x70   : > { %1389 = shalt.err (!%p1386_p4)
}
  0x71   : > { %s1551_s4 = smov 64   ;;  %s1552_s20 = smov 4  }
  0x72   : > { %1224 = dma.hbm_to_vmem [thread:$0]  (!%p2174_p7), %s1745_s18, 512, %s1749_s16, %s318_s2, %s1551_s4, %s1551_s4, %s1552_s20  }
  0x73   : > { %s340_s15 = sand.u32 1, %s1546_s29   ;;  %s1176_s19 = sshll.u32 %s1736_s23, 4 }
  0x74   : > { %s1195_s13 = sshll.u32 %s1542_s28, 8  ;;  %s344_s9 = scalar_lea.vmem [#allocation5], %s1176_s19 }
  0x75   : > { %s353_s8 = sshll.u32 %s344_s9, 4  ;;  %s1790_s22 = scalar_lea.hbm %s2141_s1, %s1195_s13  ;;  %s1792_s8 = int_to_ptr.vmem [resolvable:$true] %s353_s8 }
  0x76   : > { %s1794_s21 = scalar_lea.sflag [#allocation6], %s340_s15  ;;  %s1390_s26 = scalar_lea.hbm %s1790_s22, 256 }
  0x77   : > { %p1391_p12 = scmp.ne.s32.totalorder %s1790_s22, %s1390_s26  ;;  %s1395_s0 = scalar_lea.hbm %s2141_s1, 512 }
  0x78   : > { %p1396_p11 = scmp.lt.u32.totalorder %s1790_s22, %s2141_s1  ;;  %p1397_p1 = scmp.lt.u32.totalorder %s1395_s0, %s1390_s26 }
  0x79   : > { %p1393_p5 = pnand %p1391_p12, %p1362_p8  ;;  %p1399_p6 = scmp.lt.u32.totalorder %s1390_s26, %s1790_s22 }
  0x7a   : > { %p1398_p0 = por %p1397_p1, %p1396_p11 }
  0x7b   : > { %p1394_p10 = pneg %p1393_p5 }
  0x7c   : > { %p1400_p2 = por %p1399_p6, %p1398_p0 }
  0x7e   : > { %p1401_p3 = pnand %p1400_p2, %p1394_p10 }
  0x80   : > { %1404 = shalt.err (!%p1401_p3)
}
  0x81   : > { %s1405_s4 = scalar_lea.vmem %s1792_s8, 256  ;;  %s1553_s20 = smov [#allocation5]  }
  0x82   : > { %p1406_p9 = scmp.ne.s32.totalorder %s1792_s8, %s1405_s4  ;;  %s1410_s15 = sshll.u32 %s1553_s20, 4  ;;  %s1411_s15 = int_to_ptr.vmem [resolvable:$false] %s1410_s15 }
  0x83   : > { %s1412_s19 = scalar_lea.vmem %s1411_s15, 512  ;;  %p1413_p12 = scmp.lt.s32.totalorder %s1792_s8, %s1411_s15 }
  0x84   : > { %p1408_p13 = pnand %p1406_p9, %p1362_p8  ;;  %p1414_p5 = scmp.lt.s32.totalorder %s1412_s19, %s1405_s4 }
  0x86   : > { %p1409_p4 = pneg %p1408_p13  ;;  %p1415_p11 = por %p1414_p5, %p1413_p12 }
  0x88   : > { %p1416_p1 = pnand %p1415_p11, %p1409_p4 }
  0x8a   : > { %1419 = shalt.err (!%p1416_p1)
}
  0x8b   : > { %s1554_s26 = smov 32   ;;  %s1555_s13 = smov 2  }
  0x8c   : > { %1227 = dma.hbm_to_vmem [thread:$0]  (!%p2174_p7), %s1790_s22, 256, %s1792_s8, %s1794_s21, %s1554_s26, %s1554_s26, %s1555_s13  }
  0x8d   : > { %p2175_p8 = scmp.ne.s32.totalorder %s2165_s14, 0 }
  0x8e   : > { %s1823_s9 = sand.u32 (!%p2175_p8), 1, %s1530_s25   ;;  %p2176_p10 = scmp.ne.s32.totalorder (!%p2175_p8), %s2161_s11, 0 }
  0x8f   : > { %365 = sbr.rel (%p2175_p8) target bundleno = 335 (0x14f), region = 44  ;;  %s1180_s10 = sshll.u32 (!%p2175_p8), %s1823_s9, 5 }
  0x90   : > { %s368_s2 = scalar_lea.sflag (!%p2175_p8), [#allocation3], %s1823_s9  ;;  %s371_s23 = scalar_lea.vmem (!%p2175_p8), [#allocation2], %s1180_s10 }
  0x96   : > { %1501 = dma.done.wait (%p2176_p10), %s368_s2, 512  }
  0x97   : > { %1503 = vsyncadd (%p2176_p10), %s368_s2, 4294966784  ;;  %s376_s14 = sand.u32 1, %s1634_s30   ;;  %s1181_s17 = sshll.u32 %s1823_s9, 4 }
  0x98   : > { %s377_s22 = scalar_lea.sflag [#allocation6], %s376_s14  ;;  %s1837_s21 = scalar_lea.vmem [#allocation5], %s1181_s17 }
  0x99   : > { %1505 = dma.done.wait (%p2176_p10), %s377_s22, 256  }
  0x9a   : > { %1507 = vsyncadd (%p2176_p10), %s377_s22, 4294967040  ;;  %p2177_p7 = scmp.eq.s32.totalorder %s1634_s30, 0 }
  0x9c   : > { %1509 = dma.done.wait (%p2177_p7), [#allocation6], 128   ;;  %p2178_p0 = pmov %p2177_p7 }
  0x9e   : > { %1511 = vsyncadd (%p2178_p0), [#allocation6], 4294967168  ;;  %p2179_p6 = pmov %p2178_p0 }
  0x9f   : > { %p2180_p2 = pmov %p2178_p0 }
  0xa0   : > { %1513 = dma.done.wait (%p2179_p6), [#allocation9], 128  }
  0xa1   : > { %1515 = vsyncadd (%p2180_p2), [#allocation9], 4294967168  ;;  %v1851_v0 = vld [vmem:[%s371_s23 + $0x8] sm:$0xf]  ;;  %v1853_v1 = vld [vmem:[%s371_s23] sm:$0xf]  ;;  %v455_v18 = vlaneseq }
  0xa2   : > { %s1556_s8 = smov 64   ;;  %v1859_v2 = vld [vmem:[%s371_s23 + $0xc] sm:$0xf]  ;;  %v1861_v3 = vld [vmem:[%s371_s23 + $0x4] sm:$0xf]  ;;  %s1968_s16 = scalar_lea.vmem [#allocation10], %s1180_s10 }
  0xa3   : > { %563 = vrot.lane.b32.xlu1 %v1851_v0, %s1556_s8  ;;  %559 = vrot.lane.b32.xlu0 %v1853_v1, %s1556_s8  ;;  %v1867_v4 = vld [vmem:[%s371_s23 + $0x14] sm:$0xf]  ;;  %v1869_v5 = vld [vmem:[%s371_s23 + $0x10] sm:$0xf]  ;;  %v1557_v16 = vmov 1966171168  }
  0xa4   : > { %v1875_v6 = vld [vmem:[%s371_s23 + $0x1c] sm:$0xf]  ;;  %v1877_v7 = vld [vmem:[%s371_s23 + $0x18] sm:$0xf]  ;;  %v1884_v8 = vld [vmem:[%s1837_s21 + $0x2] sm:$0x3]  ;;  %v453_v17 = vunpack.c.l.s4 %v1557_v16 }
  0xa5   : > { %v1887_v9 = vld [vmem:[%s1837_s21] sm:$0x3]  ;;  %v1894_v10 = vld [vmem:[%s1837_s21 + $0x6] sm:$0x3]  ;;  %v1897_v11 = vld [vmem:[%s1837_s21 + $0x4] sm:$0x3] }
  0xa6   : > { %v1904_v12 = vld [vmem:[%s1837_s21 + $0xa] sm:$0x3]  ;;  %v1907_v13 = vld [vmem:[%s1837_s21 + $0x8] sm:$0x3]  ;;  %v1914_v14 = vld [vmem:[%s1837_s21 + $0xe] sm:$0x3]  ;;  %v454_v19 = vunpack.c.0.s8 %v453_v17 }
  0xa7   : > { %565 = vrot.lane.b32.xlu1 %v1859_v2, %s1556_s8  ;;  %561 = vrot.lane.b32.xlu0 %v1861_v3, %s1556_s8  ;;  %v1917_v15 = vld [vmem:[%s1837_s21 + $0xc] sm:$0x3]  ;;  %v456_v20 = vshrl.u32 %v455_v18, 7  ;;  %v449_v22 = vld [vmem:[#allocation7] sm:$0xff]  ;;  %s946_s4 = sshll.u32 %s1968_s16, 4  ;;  %s1196_s20 = sshll.u32 %s1538_s27, 9  ;;  %s2004_s4 = int_to_ptr.vmem [resolvable:$true] %s946_s4 }
  0xa8   : > { %v500_v23 = vld [vmem:[%s2143_s3] sm:$0xff]  ;;  %v451_v26 = vcombine.high %v449_v22, %v449_v22  ;;  %v687_v36 = vld [vmem:[#allocation8] sm:$0xff]  ;;  %s2013_s26 = scalar_lea.hbm %s2146_s6, %s1196_s20  ;;  %s926_s13 = scalar_lea.sflag [#allocation4], %s1823_s9 }
  0xa9   : > { %v1923_v21 = vsub.s32 %v454_v19, %v456_v20  ;;  %v502_v29 = vcombine.high %v500_v23, %v500_v23  ;;  %v1933_v33 = vsub.s32 0, %v456_v20  ;;  %v689_v52 = vcombine.high %v687_v36, %v687_v36  ;;  %v738_v53 = vld [vmem:[%s2145_s5] sm:$0xff]  ;;  %s1420_s10 = scalar_lea.vmem %s2004_s4, 512  ;;  %p2181_p9 = scmp.ne.s32.totalorder %s2162_s12, 0 }
  0xaa   : > { %p1421_p3 = scmp.ne.s32.totalorder %s2004_s4, %s1420_s10  ;;  %s1558_s2 = smov [#allocation10]  }
  0xab   : > { %569 = vrot.lane.b32.xlu1 %v1867_v4, %s1556_s8  ;;  %567 = vrot.lane.b32.xlu0 %v1869_v5, %s1556_s8  ;;  %v458_v24 = vrot.slane %v449_v22, %v1923_v21  ;;  %v509_v25 = vrot.slane %v500_v23, %v1923_v21  ;;  %v465_v32 = vrot.slane %v451_v26, %v1923_v21  ;;  %s1424_s23 = sshll.u32 %s1558_s2, 4  ;;  %s1425_s23 = int_to_ptr.vmem [resolvable:$false] %s1424_s23 }
  0xac   : > { %v516_v37 = vrot.slane %v502_v29, %v1923_v21  ;;  %v696_v44 = vrot.slane %v687_v36, %v1923_v21  ;;  %p1422_p13 = pnand %p1421_p3, %p2181_p9  ;;  %s1426_s14 = scalar_lea.vmem %s1425_s23, 1024 }
  0xad   : > { %v474_v27 = vrot.slane %v458_v24, %v1923_v21  ;;  %v466_v28 = vcombine.high %v458_v24, %v458_v24  ;;  %v525_v30 = vrot.slane %v509_v25, %v1923_v21  ;;  %v517_v31 = vcombine.high %v509_v25, %v509_v25  ;;  %p1427_p12 = scmp.lt.s32.totalorder %s2004_s4, %s1425_s23  ;;  %p1428_p5 = scmp.lt.s32.totalorder %s1426_s14, %s1420_s10 }
  0xae   : > { %v467_v40 = vcombine.high %v465_v32, %v465_v32  ;;  %v518_v45 = vcombine.high %v516_v37, %v516_v37  ;;  %v481_v51 = vrot.slane %v465_v32, %v1923_v21  ;;  %v704_v57 = vcombine.high %v696_v44, %v696_v44  ;;  %p1423_p4 = pneg %p1422_p13 }
  0xaf   : > { %573 = vrot.lane.b32.xlu1 %v1875_v6, %s1556_s8  ;;  %571 = vrot.lane.b32.xlu0 %v1877_v7, %s1556_s8  ;;  %v496_v34 = vcombine.high %v474_v27, %v474_v27  ;;  %v488_v35 = vrot.slane %v466_v28, %v1923_v21  ;;  %v547_v38 = vcombine.high %v525_v30, %v525_v30  ;;  %p1429_p11 = por %p1428_p5, %p1427_p12 }
  0xb0   : > { %v539_v39 = vrot.slane %v517_v31, %v1923_v21  ;;  %v578_v42 = vrot.slane %v474_v27, %v1933_v33  ;;  %v626_v47 = vrot.slane %v525_v30, %v1933_v33  ;;  %v495_v50 = vrot.slane %v467_v40, %v1923_v21 }
  0xb1   : > { %v586_v41 = vrot.slane %v496_v34, %v1933_v33  ;;  %v498_v43 = vcombine.high %v488_v35, %v488_v35  ;;  %v634_v46 = vrot.slane %v547_v38, %v1933_v33  ;;  %v582_v49 = vrot.slane %v488_v35, %v1933_v33  ;;  %p1430_p1 = pnand %p1429_p11, %p1423_p4 }
  0xb2   : > { %v549_v48 = vcombine.high %v539_v39, %v539_v39  ;;  %v615_v55 = vmul.f32 %v578_v42, %v1853_v1  ;;  %v1953_v58 = vrot.slane %v696_v44, %v1923_v21  ;;  %v630_v61 = vrot.slane %v539_v39, %v1933_v33 }
  0xb3   : > { %799 = vrot.lane.b32.xlu1 %v1884_v8, %s1556_s8  ;;  %797 = vrot.lane.b32.xlu0 %v1887_v9, %s1556_s8  ;;  %v617_v54 = vmul.f32 %v586_v41, %v1851_v0  ;;  %v590_v56 = vrot.slane %v498_v43, %v1933_v33  ;;  %v546_v62 = vrot.slane %v518_v45, %v1923_v21 }
  0xb4   : > { %v532_v63 = vrot.slane %v516_v37, %v1923_v21  ;;  %v638_v0 = vrot.slane %v549_v48, %v1933_v33  ;;  %v747_v1 = vrot.slane %v738_v53, %v1923_v21  ;;  %v616_v18 = vmul.f32 %v582_v49, %v1861_v3 }
  0xb5   : > { %v598_v19 = vrot.slane %v495_v50, %v1933_v33  ;;  %v594_v20 = vrot.slane %v481_v51, %v1933_v33  ;;  %v497_v22 = vcombine.high %v481_v51, %v481_v51  ;;  %v618_v23 = vmul.f32 %v590_v56, %v1859_v2 }
  0xb6   : > { %v499_v24 = vcombine.high %v495_v50, %v495_v50  ;;  %v646_v29 = vrot.slane %v546_v62, %v1933_v33  ;;  %v642_v30 = vrot.slane %v532_v63, %v1933_v33  ;;  %v548_v31 = vcombine.high %v532_v63, %v532_v63 }
  0xb7   : > { %803 = vrot.lane.b32.xlu1 %v1894_v10, %s1556_s8  ;;  %801 = vrot.lane.b32.xlu0 %v1897_v11, %s1556_s8  ;;  %v740_v32 = vcombine.high %v738_v53, %v738_v53  ;;  %v550_v34 = vcombine.high %v546_v62, %v546_v62  ;;  %v755_v35 = vcombine.high %v747_v1, %v747_v1 }
  0xb8   : > { %v619_v36 = vmul.f32 %v594_v20, %v1869_v5  ;;  %v602_v37 = vrot.slane %v497_v22, %v1933_v33  ;;  %v726_v38 = vrot.slane %v704_v57, %v1923_v21  ;;  %v703_v39 = vrot.slane %v689_v52, %v1923_v21 }
  0xb9   : > { %v620_v40 = vmul.f32 %v598_v19, %v1867_v4  ;;  %v606_v41 = vrot.slane %v499_v24, %v1933_v33  ;;  %v816_v44 = vrot.slane %v1953_v58, %v1933_v33  ;;  %v650_v5 = vrot.slane %v548_v31, %v1933_v33 }
  0xba   : > { %v754_v48 = vrot.slane %v740_v32, %v1923_v21  ;;  %v654_v50 = vrot.slane %v550_v34, %v1933_v33  ;;  %v777_v51 = vrot.slane %v755_v35, %v1923_v21  ;;  %v621_v52 = vmul.f32 %v602_v37, %v1877_v7 }
  0xbb   : > { %807 = vrot.lane.b32.xlu1 %v1904_v12, %s1556_s8  ;;  %805 = vrot.lane.b32.xlu0 %v1907_v13, %s1556_s8  ;;  %v820_v53 = vrot.slane %v726_v38, %v1933_v33  ;;  %v622_v56 = vmul.f32 %v606_v41, %v1875_v6  ;;  %v705_v57 = vcombine.high %v703_v39, %v703_v39 }
  0xbc   : > { %v2002_v20 = vrot.slane %v703_v39, %v1923_v21  ;;  %v853_v22 = vmul.f32 %v816_v44, %v1887_v9  ;;  %v2017_v9 = vrot.slane %v754_v48, %v1923_v21 }
  0xbd   : > { %v854_v6 = vmul.f32 %v820_v53, %v1884_v8 }
  0xbe   : > { %v735_v34 = vcombine.high %v2002_v20, %v2002_v20 }
  0xbf   : > { %811 = vrot.lane.b32.xlu1 %v1914_v14, %s1556_s8  ;;  %809 = vrot.lane.b32.xlu0 %v1917_v15, %s1556_s8 }
 0x115   : > { %v564_v59 = vpop.permute.xlu1 %563  ;;  %v560_v60 = vpop.permute.xlu0 %559 }
 0x116   : > { %v665_v16 = vmul.f32 %v634_v46, %v564_v59  ;;  %v663_v17 = vmul.f32 %v626_v47, %v560_v60  ;;  %v763_v47 = vrot.slane %v747_v1, %v1923_v21  ;;  %v868_v1 = vrot.slane %v777_v51, %v1933_v33 }
 0x118   : > { %v673_v25 = vadd.f32 %v665_v16, %v617_v54  ;;  %v671_v26 = vadd.f32 %v663_v17, %v615_v55  ;;  %v736_v54 = vcombine.high %v726_v38, %v726_v38  ;;  %v734_v55 = vcombine.high %v1953_v58, %v1953_v58 }
 0x119   : > { %v566_v27 = vpop.permute.xlu1 %565  ;;  %v562_v28 = vpop.permute.xlu0 %561  ;;  %v864_v63 = vrot.slane %v763_v47, %v1933_v33  ;;  %v785_v16 = vcombine.high %v763_v47, %v763_v47  ;;  %v756_v17 = vcombine.high %v754_v48, %v754_v48  ;;  %v787_v58 = vcombine.high %v777_v51, %v777_v51 }
 0x11a   : > { %681 = vst [vmem:[%s1968_s16 + $0x8] sm:$0xf] %v673_v25  ;;  %679 = vst [vmem:[%s1968_s16] sm:$0xf] %v671_v26  ;;  %v666_v3 = vmul.f32 %v638_v0, %v566_v27  ;;  %v664_v2 = vmul.f32 %v630_v61, %v562_v28  ;;  %v824_v19 = vrot.slane %v734_v55, %v1933_v33 }
 0x11b   : > { %v872_v27 = vrot.slane %v785_v16, %v1933_v33  ;;  %v784_v31 = vrot.slane %v756_v17, %v1923_v21 }
 0x11c   : > { %v674_v42 = vadd.f32 %v666_v3, %v618_v23  ;;  %v672_v43 = vadd.f32 %v664_v2, %v616_v18  ;;  %v828_v18 = vrot.slane %v736_v54, %v1933_v33  ;;  %v2008_v23 = vrot.slane %v705_v57, %v1923_v21 }
 0x11d   : > { %v570_v45 = vpop.permute.xlu1 %569  ;;  %v568_v46 = vpop.permute.xlu0 %567  ;;  %v855_v3 = vmul.f32 %v824_v19, %v1897_v11  ;;  %v832_v2 = vrot.slane %v2002_v20, %v1933_v33 }
 0x11e   : > { %682 = vst [vmem:[%s1968_s16 + $0xc] sm:$0xf] %v674_v42  ;;  %680 = vst [vmem:[%s1968_s16 + $0x4] sm:$0xf] %v672_v43  ;;  %v668_v49 = vmul.f32 %v646_v29, %v570_v45  ;;  %v667_v4 = vmul.f32 %v642_v30, %v568_v46  ;;  %v876_v30 = vrot.slane %v787_v58, %v1933_v33 }
 0x11f   : > { %v856_v32 = vmul.f32 %v828_v18, %v1894_v10 }
 0x120   : > { %v676_v59 = vadd.f32 %v668_v49, %v620_v40  ;;  %v675_v60 = vadd.f32 %v667_v4, %v619_v36 }
 0x121   : > { %v574_v61 = vpop.permute.xlu1 %573  ;;  %v572_v62 = vpop.permute.xlu0 %571 }
 0x122   : > { %684 = vst [vmem:[%s1968_s16 + $0x14] sm:$0xf] %v676_v59  ;;  %683 = vst [vmem:[%s1968_s16 + $0x10] sm:$0xf] %v675_v60  ;;  %v670_v7 = vmul.f32 %v654_v50, %v574_v61  ;;  %v669_v0 = vmul.f32 %v650_v5, %v572_v62 }
 0x124   : > { %v678_v24 = vadd.f32 %v670_v7, %v622_v56  ;;  %v677_v25 = vadd.f32 %v669_v0, %v621_v52 }
 0x125   : > { %v800_v8 = vpop.permute.xlu1 %799  ;;  %v798_v26 = vpop.permute.xlu0 %797 }
 0x126   : > { %686 = vst [vmem:[%s1968_s16 + $0x1c] sm:$0xf] %v678_v24  ;;  %685 = vst [vmem:[%s1968_s16 + $0x18] sm:$0xf] %v677_v25  ;;  %v902_v28 = vmul.f32 %v868_v1, %v800_v8  ;;  %v901_v29 = vmul.f32 %v864_v63, %v798_v26 }
 0x127   : > { %1433 = shalt.err (!%p1430_p1)
}
 0x128   : > { %s1434_s22 = scalar_lea.hbm %s2013_s26, 512  ;;  %s1438_s11 = scalar_lea.hbm %s2146_s6, 1024 }
 0x129   : > { %p1435_p8 = scmp.ne.s32.totalorder %s2013_s26, %s1434_s22  ;;  %p1439_p0 = scmp.lt.u32.totalorder %s2013_s26, %s2146_s6 }
 0x12a   : > { %p1440_p6 = scmp.lt.u32.totalorder %s1438_s11, %s1434_s22  ;;  %p1442_p3 = scmp.lt.u32.totalorder %s1434_s22, %s2013_s26 }
 0x12b   : > { %p1436_p10 = pnand %p1435_p8, %p2181_p9 }
 0x12c   : > { %p1441_p2 = por %p1440_p6, %p1439_p0 }
 0x12d   : > { %p1437_p7 = pneg %p1436_p10 }
 0x12e   : > { %p1443_p13 = por %p1442_p3, %p1441_p2 }
 0x130   : > { %p1444_p4 = pnand %p1443_p13, %p1437_p7 }
 0x132   : > { %1447 = shalt.err (!%p1444_p4)
}
 0x133   : > { %s1559_s16 = smov 4   ;;  %v836_v10 = vrot.slane %v2008_v23, %v1933_v33  ;;  %v737_v11 = vcombine.high %v2008_v23, %v2008_v23  ;;  %v910_v21 = vadd.f32 %v902_v28, %v854_v6  ;;  %v909_v35 = vadd.f32 %v901_v29, %v853_v22  ;;  %v804_v36 = vpop.permute.xlu1 %803  ;;  %v802_v37 = vpop.permute.xlu0 %801  ;;  %s2065_s20 = scalar_lea.vmem [#allocation11], %s1181_s17 }
 0x134   : > { %1210 = dma.vmem_to_hbm [thread:$0]  (%p2181_p9), %s2004_s4, 512, %s2013_s26, %s926_s13, %s1556_s8, %s1556_s8, %s1559_s16   ;;  %v880_v38 = vrot.slane %v2017_v9, %v1933_v33  ;;  %v786_v39 = vcombine.high %v2017_v9, %v2017_v9  ;;  %v904_v40 = vmul.f32 %v876_v30, %v804_v36  ;;  %v903_v41 = vmul.f32 %v872_v27, %v802_v37 }
 0x135   : > { %918 = vst [vmem:[%s2065_s20 + $0x2] sm:$0x3] %v910_v21  ;;  %917 = vst [vmem:[%s2065_s20] sm:$0x3] %v909_v35  ;;  %v884_v42 = vrot.slane %v784_v31, %v1933_v33  ;;  %v788_v43 = vcombine.high %v784_v31, %v784_v31  ;;  %v857_v44 = vmul.f32 %v832_v2, %v1907_v13  ;;  %s964_s17 = sshll.u32 %s2065_s20, 4  ;;  %s1197_s8 = sshll.u32 %s1538_s27, 8  ;;  %s2082_s17 = int_to_ptr.vmem [resolvable:$true] %s964_s17 }
 0x136   : > { %v840_v45 = vrot.slane %v735_v34, %v1933_v33  ;;  %v858_v46 = vmul.f32 %v836_v10, %v1904_v12  ;;  %v844_v5 = vrot.slane %v737_v11, %v1933_v33  ;;  %v912_v47 = vadd.f32 %v904_v40, %v856_v32  ;;  %s2089_s19 = scalar_lea.hbm %s2147_s7, %s1197_s8  ;;  %s931_s27 = scalar_lea.sflag [#allocation12], %s1823_s9 }
 0x137   : > { %v911_v48 = vadd.f32 %v903_v41, %v855_v3  ;;  %v808_v49 = vpop.permute.xlu1 %807  ;;  %v806_v4 = vpop.permute.xlu0 %805  ;;  %v892_v52 = vrot.slane %v788_v43, %v1933_v33  ;;  %v888_v13 = vrot.slane %v786_v39, %v1933_v33  ;;  %s1448_s26 = scalar_lea.vmem %s2082_s17, 256  ;;  %s1560_s13 = smov [#allocation11]  }
 0x138   : > { %920 = vst [vmem:[%s2065_s20 + $0x6] sm:$0x3] %v912_v47  ;;  %v906_v50 = vmul.f32 %v884_v42, %v808_v49  ;;  %v905_v51 = vmul.f32 %v880_v38, %v806_v4  ;;  %v860_v12 = vmul.f32 %v844_v5, %v1914_v14  ;;  %v859_v53 = vmul.f32 %v840_v45, %v1917_v15  ;;  %p1449_p12 = scmp.ne.s32.totalorder %s2082_s17, %s1448_s26  ;;  %s1452_s10 = sshll.u32 %s1560_s13, 4  ;;  %s1453_s10 = int_to_ptr.vmem [resolvable:$false] %s1452_s10 }
 0x139   : > { %919 = vst [vmem:[%s2065_s20 + $0x4] sm:$0x3] %v911_v48  ;;  %s1454_s2 = scalar_lea.vmem %s1453_s10, 512  ;;  %p1455_p1 = scmp.lt.s32.totalorder %s2082_s17, %s1453_s10 }
 0x13a   : > { %v914_v54 = vadd.f32 %v906_v50, %v858_v46  ;;  %v913_v55 = vadd.f32 %v905_v51, %v857_v44  ;;  %p1450_p5 = pnand %p1449_p12, %p2181_p9  ;;  %p1456_p8 = scmp.lt.s32.totalorder %s1454_s2, %s1448_s26 }
 0x13b   : > { %v812_v56 = vpop.permute.xlu1 %811  ;;  %v810_v57 = vpop.permute.xlu0 %809 }
 0x13c   : > { %922 = vst [vmem:[%s2065_s20 + $0xa] sm:$0x3] %v914_v54  ;;  %921 = vst [vmem:[%s2065_s20 + $0x8] sm:$0x3] %v913_v55  ;;  %v908_v33 = vmul.f32 %v892_v52, %v812_v56  ;;  %v907_v59 = vmul.f32 %v888_v13, %v810_v57  ;;  %p1451_p11 = pneg %p1450_p5  ;;  %p1457_p10 = por %p1456_p8, %p1455_p1 }
 0x13e   : > { %v916_v14 = vadd.f32 %v908_v33, %v860_v12  ;;  %v915_v15 = vadd.f32 %v907_v59, %v859_v53  ;;  %p1458_p7 = pnand %p1457_p10, %p1451_p11 }
 0x140   : > { %924 = vst [vmem:[%s2065_s20 + $0xe] sm:$0x3] %v916_v14  ;;  %923 = vst [vmem:[%s2065_s20 + $0xc] sm:$0x3] %v915_v15 }
 0x141   : > { %1461 = shalt.err (!%p1458_p7)
}
 0x142   : > { %s1462_s23 = scalar_lea.hbm %s2089_s19, 256  ;;  %s1466_s21 = scalar_lea.hbm %s2147_s7, 512 }
 0x143   : > { %p1463_p0 = scmp.ne.s32.totalorder %s2089_s19, %s1462_s23  ;;  %p1467_p3 = scmp.lt.u32.totalorder %s2089_s19, %s2147_s7 }
 0x144   : > { %p1468_p13 = scmp.lt.u32.totalorder %s1466_s21, %s1462_s23  ;;  %p1470_p12 = scmp.lt.u32.totalorder %s1462_s23, %s2089_s19 }
 0x145   : > { %p1464_p6 = pnand %p1463_p0, %p2181_p9 }
 0x146   : > { %p1469_p4 = por %p1468_p13, %p1467_p3 }
 0x147   : > { %p1465_p2 = pneg %p1464_p6 }
 0x148   : > { %p1471_p5 = por %p1470_p12, %p1469_p4 }
 0x14a   : > { %p1472_p11 = pnand %p1471_p5, %p1465_p2 }
 0x14c   : > { %1475 = shalt.err (!%p1472_p11)
}
 0x14d   : > { %s1561_s0 = smov 32   ;;  %s1562_s18 = smov 2  }
 0x14e   : > { %1211 = dma.vmem_to_hbm [thread:$0]  (%p2181_p9), %s2082_s17, 256, %s2089_s19, %s931_s27, %s1561_s0, %s1561_s0, %s1562_s18  }
 0x14f PF: > { %s2182_s16 = sld [smem:[#allocation20_spill]]  ;;  %s979_s20 = sand.u32 1, %s1526_s24  }
 0x150   : > { %p2184_p8 = scmp.ge.s32.totalorder %s1546_s29, 2  ;;  %s980_s8 = scalar_lea.sflag [#allocation4], %s979_s20 }
 0x155   : > { %p2183_p1 = scmp.ne.s32.totalorder %s2182_s16, 0 }
 0x157   : > { %p1229_p10 = pnand %p2184_p8, %p2183_p1 }
 0x159   : > { %1517 = dma.done.wait (!%p1229_p10), %s980_s8, 512  }
 0x15a   : > { %1519 = vsyncadd (!%p1229_p10), %s980_s8, 4294966784  ;;  %s989_s4 = scalar_lea.sflag [#allocation12], %s979_s20 }
 0x15b   : > { %1521 = dma.done.wait (!%p1229_p10), %s989_s4, 256  }
 0x15c   : > { %1523 = vsyncadd (!%p1229_p10), %s989_s4, 4294967040  ;;  %s31_s29 = sadd.s32 1, %s1546_s29   ;;  %s2185_s12 = sld [smem:[#allocation19_spill]] }
 0x15d   : > { %p28_p7 = scmp.ge.s32.totalorder %s31_s29, 4   ;;  %s2186_s26 = sld [smem:[#allocation22_spill]] }
 0x15e   : > { %s2187_s9 = sld [smem:[#allocation21_spill]]  ;;  %s2188_s24 = smov %s1530_s25 }
 0x15f   : > { %s2190_s27 = smov %s1542_s28  ;;  %30 = sbr.rel (!%p28_p7) target bundleno = 15 (0xf), region = 135 }
 0x162   : > { %s2189_s25 = smov %s2185_s12 }
 0x164   : > { %s2191_s28 = smov %s2187_s9 }
 0x166   :  { %994 = vsyncpa [#allocation3], 1 }
 0x167   :  { %996 = vsyncpa [#allocation3 + $0x1], 1 }
 0x168   :  { %997 = vsyncpa [#allocation6], 1 }
 0x169   :  { %999 = vsyncpa [#allocation6 + $0x1], 1 }
 0x16a   :  { %1000 = vsyncpa [#allocation9], 1 }
 0x16b   :  { %1001 = vsyncpa [#allocation4], 1 }
 0x16c   :  { %1003 = vsyncpa [#allocation4 + $0x1], 1 }
 0x16d   :  { %1004 = vsyncpa [#allocation12], 1 }
 0x16e   :  { %1006 = vsyncpa [#allocation12 + $0x1], 1 }

</bundles_post_ra>
